<compile_context>
chip_gen: v5e
topology: v5e:2x2
jax: 0.10.0
libtpu: 0.0.40
codegen_flags: <defaults>
</compile_context>

<pallas_src>
import jax
import jax.numpy as jnp
import numpy as np
from jax.experimental import pallas as pl
from jax.experimental.pallas import tpu as pltpu


# ----------------------------------------------------------------------------
# Kernel: fused split-1x1-conv -> BN shift -> LeakyReLU -> 1x1 conv -> bias ->
# sigmoid over (bn images) x (tile_m pixels), channel-major layout.
# ----------------------------------------------------------------------------
def _decomposition_kernel(xf_ref, xh_ref, w1f_ref, w1h_ref, shift_ref,
                          w2_ref, b2_ref, o_ref):
    # xf_ref/xh_ref: (bn, C_half, tile_m)   channels on sublanes, pixels on lanes
    # w1f/w1h:       (C, C_half)            BN scale already folded in
    # shift:         (C, 1) f32
    # w2:            (1, C) f32,  b2: (1, 1) f32
    # o_ref:         (bn, 1, tile_m)        lane-dense output rows
    bn = xf_ref.shape[0]
    w1f = w1f_ref[...]
    w1h = w1h_ref[...]
    shift = shift_ref[...]
    w2 = w2_ref[...]
    b2 = b2_ref[...]

    for b in range(bn):                       # static, fully unrolled
        xf = xf_ref[b]                        # (C_half, tile_m), native dtype
        xh = xh_ref[b]
        # 1x1 conv over the (virtually) concatenated channels == two matmuls.
        h = jnp.dot(w1f, xf, preferred_element_type=jnp.float32)
        h = h + jnp.dot(w1h, xh, preferred_element_type=jnp.float32)
        # BatchNorm (inference): scale folded into w1, only the shift remains.
        h = h + shift
        # LeakyReLU (negative_slope = 0.01).
        h = jnp.maximum(h, 0.01 * h)
        # Second 1x1 conv (C -> 1) with bias, then sigmoid; (1, tile_m) row.
        y = jnp.dot(w2, h, preferred_element_type=jnp.float32) + b2
        o_ref[b] = jax.nn.sigmoid(y).astype(o_ref.dtype)


def _choose_pixel_tile(hw, target):
    """Largest lane-aligned tile <= target that divides hw, else target."""
    target = max(128, (target // 128) * 128)
    if hw <= target:
        return hw
    t = target
    while t >= 128:
        if hw % t == 0:
            return t
        t -= 128
    return target   # remainder handled by Pallas boundary masking


def decomposition_pallas(xf, xh, params, *, tile_pixels=16384, out_dtype=None):
    """xf, xh: (N, h, H, W) float32/bfloat16 (NCHW).  Returns att: (N, 1, H, W)."""
    n, ch, hgt, wid = xf.shape
    assert xh.shape == xf.shape
    c = 2 * ch
    hw = hgt * wid
    out_dtype = xf.dtype if out_dtype is None else out_dtype

    # ---- free reshapes: NCHW -> (N, C_half, H*W), no copy/transpose ----
    xf3 = xf.reshape(n, ch, hw)
    xh3 = xh.reshape(n, ch, hw)

    # Pixel tile: large, lane-aligned, evenly dividing hw when possible.
    tile_m = _choose_pixel_tile(hw, tile_pixels)
    # Small feature maps: batch several images per grid step so each step still
    # moves ~tile_pixels worth of data (amortizes ~0.35 us per-step overhead).
    bn = int(min(n, max(1, tile_pixels // max(tile_m, 1))))
    bn = max(1, min(bn, 32))

    num_batch_tiles = pl.cdiv(n, bn)
    num_pixel_tiles = pl.cdiv(hw, tile_m)

    # ---- parameter prep (tiny, constant-folded under jit) ----
    # Fold BN scale into the first conv; keep only the shift in-kernel.
    w1_scaled = params["w1"] * params["bn_scale"][None, :]      # (in=C, out=C)
    w1t = jnp.transpose(w1_scaled).astype(xf.dtype)             # (out=C, in=C)
    w1f = w1t[:, :ch]                                           # (C, C_half) for xf
    w1h = w1t[:, ch:]                                           # (C, C_half) for xh
    shift = params["bn_shift"].reshape(c, 1).astype(jnp.float32)
    w2t = jnp.transpose(params["w2"]).astype(jnp.float32)       # (1, C)
    b2 = params["b2"].reshape(1, 1).astype(jnp.float32)

    in_itemsize = jnp.dtype(xf.dtype).itemsize
    out_itemsize = jnp.dtype(out_dtype).itemsize

    # VMEM budget: 2 inputs x double buffer + double-buffered output (sublane-
    # padded).  Raise the scoped limit (v5e default is 16 MiB) but stay <= 64 MiB
    # so the request is legal on v7x.
    pad_ch = ((ch + 7) // 8) * 8
    vmem_est = (2 * 2 * bn * pad_ch * tile_m * in_itemsize
                + 2 * bn * 8 * tile_m * out_itemsize)
    vmem_limit = int(min(max(2 * vmem_est + (8 << 20), 32 << 20), 64 << 20))

    cost = pl.CostEstimate(
        flops=int(2 * n * hw * (c * c + c)),
        transcendentals=int(n * hw),
        bytes_accessed=int(2 * n * ch * hw * in_itemsize + n * hw * out_itemsize),
    )

    out = pl.pallas_call(
        _decomposition_kernel,
        out_shape=jax.ShapeDtypeStruct((n, 1, hw), out_dtype),
        grid_spec=pltpu.PrefetchScalarGridSpec(
            num_scalar_prefetch=0,
            grid=(num_batch_tiles, num_pixel_tiles),
            in_specs=[
                pl.BlockSpec((bn, ch, tile_m), lambda b, j: (b, 0, j)),  # xf tile
                pl.BlockSpec((bn, ch, tile_m), lambda b, j: (b, 0, j)),  # xh tile
                pl.BlockSpec((c, ch), lambda b, j: (0, 0)),              # w1f
                pl.BlockSpec((c, ch), lambda b, j: (0, 0)),              # w1h
                pl.BlockSpec((c, 1), lambda b, j: (0, 0)),               # bn shift
                pl.BlockSpec((1, c), lambda b, j: (0, 0)),               # w2^T
                pl.BlockSpec((1, 1), lambda b, j: (0, 0)),               # b2
            ],
            out_specs=pl.BlockSpec((bn, 1, tile_m), lambda b, j: (b, 0, j)),
        ),
        compiler_params=pltpu.CompilerParams(
            dimension_semantics=("parallel", "parallel"),
            vmem_limit_bytes=vmem_limit),
        cost_estimate=cost,
    )(xf3, xh3, w1f, w1h, shift, w2t, b2)

    # ---- free reshape: (N, 1, H*W) -> (N, 1, H, W) ----
    return out.reshape(n, 1, hgt, wid)


# ----------------------------------------------------------------------------
# Deterministic synthetic parameters (shapes from Decomposition.__init__).
# ----------------------------------------------------------------------------
def make_params(hidden_dim=10, eps=1e-5):
    c = 2 * hidden_dim
    k = jax.random.PRNGKey(0)
    k1, k2, k3, k4, k5, k6 = jax.random.split(k, 6)

    # Conv2d(2h, 2h, 1, bias=False): weight (out, in, 1, 1) -> matmul form (in, out)
    conv1_w = 0.1 * jax.random.normal(k1, (c, c, 1, 1), jnp.float32)
    w1 = jnp.transpose(conv1_w[:, :, 0, 0], (1, 0))                 # (in, out)

    # BatchNorm2d(2h) inference stats/affine, folded to scale/shift.
    gamma = 1.0 + 0.05 * jax.random.normal(k2, (c,), jnp.float32)
    beta = 0.05 * jax.random.normal(k3, (c,), jnp.float32)
    running_mean = 0.1 * jax.random.normal(k4, (c,), jnp.float32)
    running_var = 1.0 + 0.1 * jax.random.uniform(k5, (c,), jnp.float32)
    inv_std = 1.0 / jnp.sqrt(running_var + eps)
    bn_scale = gamma * inv_std
    bn_shift = beta - running_mean * bn_scale
    # TODO(synk): InPlaceABNSync's cross-replica batch-stat sync (training mode)
    # has no single-kernel equivalent; inference-mode BN folding is used here.

    # Conv2d(2h, 1, 1, bias=True): weight (1, 2h, 1, 1), bias (1,)
    conv2_w = 0.1 * jax.random.normal(k6, (1, c, 1, 1), jnp.float32)
    w2 = jnp.transpose(conv2_w[:, :, 0, 0], (1, 0))                 # (in, 1)
    b2 = jnp.array([0.1], jnp.float32)

    return {"w1": w1, "bn_scale": bn_scale, "bn_shift": bn_shift,
            "w2": w2, "b2": b2}


# Pure-JAX reference (same math, NCHW semantics) for a correctness check.
def decomposition_ref(xf, xh, params):
    x = jnp.concatenate([xf, xh], axis=1)                       # (N, C, H, W)
    h = jnp.einsum('nihw,io->nohw', x, params["w1"])
    h = (h * params["bn_scale"][None, :, None, None]
         + params["bn_shift"][None, :, None, None])
    h = jnp.where(h > 0, h, 0.01 * h)
    y = (jnp.einsum('nihw,io->nohw', h, params["w2"])
         + params["b2"][None, :, None, None])
    return jax.nn.sigmoid(y)


if __name__ == "__main__":
    hidden_dim = 10
    N, H, W = 2, 16, 16   # hw = 256 -> 2 images batched into one grid step

    key = jax.random.PRNGKey(0)
    kf, kh = jax.random.split(key)
    xf = jax.random.normal(kf, (N, hidden_dim, H, W), jnp.float32)
    xh = jax.random.normal(kh, (N, hidden_dim, H, W), jnp.float32)

    params = make_params(hidden_dim)

    att = decomposition_pallas(xf, xh, params)
    att = jax.block_until_ready(att)

    ref = jax.block_until_ready(decomposition_ref(xf, xh, params))
    np.testing.assert_allclose(np.asarray(att), np.asarray(ref),
                               rtol=1e-5, atol=1e-5)
    assert att.shape == (N, 1, H, W)
    print("KERNEL_OK")
</pallas_src>

<mosaic_0001>
module attributes {stable_mosaic.version = 11 : i64} {
  func.func @_decomposition_kernel(%arg0: i32, %arg1: i32, %arg2: memref<2x10x256xf32, #tpu.memory_space<vmem>>, %arg3: memref<2x10x256xf32, #tpu.memory_space<vmem>>, %arg4: memref<20x10xf32, #tpu.memory_space<vmem>>, %arg5: memref<20x10xf32, #tpu.memory_space<vmem>>, %arg6: memref<20x1xf32, #tpu.memory_space<vmem>>, %arg7: memref<1x20xf32, #tpu.memory_space<vmem>>, %arg8: memref<1x1xf32, #tpu.memory_space<vmem>>, %arg9: memref<2x1x256xf32, #tpu.memory_space<vmem>>) attributes {dimension_semantics = [#tpu.dimension_semantics<parallel>, #tpu.dimension_semantics<parallel>], iteration_bounds = array<i64: 1, 1>, scalar_prefetch = 0 : i64, scratch_operands = 0 : i64, tpu.core_type = #tpu.core_type<tc>, window_params = [{transform_indices = @transform_0, window_bounds = array<i64: 2, 10, 256>}, {transform_indices = @transform_1, window_bounds = array<i64: 2, 10, 256>}, {pipeline_mode = #tpu.pipeline_mode<synchronous>, transform_indices = @transform_2, window_bounds = array<i64: 20, 10>}, {pipeline_mode = #tpu.pipeline_mode<synchronous>, transform_indices = @transform_3, window_bounds = array<i64: 20, 10>}, {pipeline_mode = #tpu.pipeline_mode<synchronous>, transform_indices = @transform_4, window_bounds = array<i64: 20, 1>}, {pipeline_mode = #tpu.pipeline_mode<synchronous>, transform_indices = @transform_5, window_bounds = array<i64: 1, 20>}, {pipeline_mode = #tpu.pipeline_mode<synchronous>, transform_indices = @transform_6, window_bounds = array<i64: 1, 1>}, {transform_indices = @transform_7, window_bounds = array<i64: 2, 1, 256>}]} {
    %c0 = arith.constant 0 : index
    %c0_0 = arith.constant 0 : index
    %0 = vector.load %arg4[%c0, %c0_0] : memref<20x10xf32, #tpu.memory_space<vmem>>, vector<20x10xf32>
    %c0_1 = arith.constant 0 : index
    %c0_2 = arith.constant 0 : index
    %1 = vector.load %arg5[%c0_1, %c0_2] : memref<20x10xf32, #tpu.memory_space<vmem>>, vector<20x10xf32>
    %c0_3 = arith.constant 0 : index
    %c0_4 = arith.constant 0 : index
    %2 = vector.load %arg6[%c0_3, %c0_4] : memref<20x1xf32, #tpu.memory_space<vmem>>, vector<20x1xf32>
    %c0_5 = arith.constant 0 : index
    %c0_6 = arith.constant 0 : index
    %3 = vector.load %arg7[%c0_5, %c0_6] : memref<1x20xf32, #tpu.memory_space<vmem>>, vector<1x20xf32>
    %c0_7 = arith.constant 0 : index
    %c0_8 = arith.constant 0 : index
    %4 = vector.load %arg8[%c0_7, %c0_8] : memref<1x1xf32, #tpu.memory_space<vmem>>, vector<1x1xf32>
    %c0_9 = arith.constant 0 : index
    %c0_10 = arith.constant 0 : index
    %c0_11 = arith.constant 0 : index
    %5 = vector.load %arg2[%c0_9, %c0_10, %c0_11] : memref<2x10x256xf32, #tpu.memory_space<vmem>>, vector<1x10x256xf32>
    %6 = vector.shape_cast %5 : vector<1x10x256xf32> to vector<10x256xf32>
    %c0_12 = arith.constant 0 : index
    %c0_13 = arith.constant 0 : index
    %c0_14 = arith.constant 0 : index
    %7 = vector.load %arg3[%c0_12, %c0_13, %c0_14] : memref<2x10x256xf32, #tpu.memory_space<vmem>>, vector<1x10x256xf32>
    %8 = vector.shape_cast %7 : vector<1x10x256xf32> to vector<10x256xf32>
    %cst = arith.constant dense<0.000000e+00> : vector<20x256xf32>
    %9 = tpu.matmul %0, %6, %cst {dimension_numbers = #tpu.dot_dimension_numbers<[1], [0], [0], [1], [0, 0, 1, 1], [], []>} : vector<20x10xf32>, vector<10x256xf32>, vector<20x256xf32> -> vector<20x256xf32>
    %cst_15 = arith.constant dense<0.000000e+00> : vector<20x256xf32>
    %10 = tpu.matmul %1, %8, %cst_15 {dimension_numbers = #tpu.dot_dimension_numbers<[1], [0], [0], [1], [0, 0, 1, 1], [], []>} : vector<20x10xf32>, vector<10x256xf32>, vector<20x256xf32> -> vector<20x256xf32>
    %11 = arith.addf %9, %10 : vector<20x256xf32>
    %12 = vector.broadcast %2 : vector<20x1xf32> to vector<20x256xf32>
    %13 = arith.addf %11, %12 : vector<20x256xf32>
    %cst_16 = arith.constant 0.00999999977 : f32
    %14 = vector.broadcast %cst_16 : f32 to vector<20x256xf32>
    %15 = arith.mulf %14, %13 : vector<20x256xf32>
    %16 = arith.maximumf %13, %15 : vector<20x256xf32>
    %cst_17 = arith.constant dense<0.000000e+00> : vector<1x256xf32>
    %17 = tpu.matmul %3, %16, %cst_17 {dimension_numbers = #tpu.dot_dimension_numbers<[1], [0], [0], [1], [0, 0, 1, 1], [], []>} : vector<1x20xf32>, vector<20x256xf32>, vector<1x256xf32> -> vector<1x256xf32>
    %18 = vector.broadcast %4 : vector<1x1xf32> to vector<1x256xf32>
    %19 = arith.addf %17, %18 : vector<1x256xf32>
    %20 = arith.negf %19 : vector<1x256xf32>
    %21 = math.exp %20 : vector<1x256xf32>
    %cst_18 = arith.constant 1.000000e+00 : f32
    %22 = vector.broadcast %cst_18 : f32 to vector<1x256xf32>
    %23 = arith.addf %22, %21 : vector<1x256xf32>
    %24 = arith.divf %22, %23 : vector<1x256xf32>
    %c0_19 = arith.constant 0 : index
    %c0_20 = arith.constant 0 : index
    %c0_21 = arith.constant 0 : index
    %25 = vector.load %arg9[%c0_19, %c0_20, %c0_21] : memref<2x1x256xf32, #tpu.memory_space<vmem>>, vector<1x1x256xf32>
    %26 = vector.shape_cast %25 : vector<1x1x256xf32> to vector<1x256xf32>
    %27 = vector.shape_cast %24 : vector<1x256xf32> to vector<1x1x256xf32>
    tpu.vector_store %arg9[%c0_19, %c0_20, %c0_21], %27 {strides = array<i32>} : memref<2x1x256xf32, #tpu.memory_space<vmem>>, vector<1x1x256xf32>,
    %c1 = arith.constant 1 : index
    %c0_22 = arith.constant 0 : index
    %c0_23 = arith.constant 0 : index
    %28 = vector.load %arg2[%c1, %c0_22, %c0_23] : memref<2x10x256xf32, #tpu.memory_space<vmem>>, vector<1x10x256xf32>
    %29 = vector.shape_cast %28 : vector<1x10x256xf32> to vector<10x256xf32>
    %c1_24 = arith.constant 1 : index
    %c0_25 = arith.constant 0 : index
    %c0_26 = arith.constant 0 : index
    %30 = vector.load %arg3[%c1_24, %c0_25, %c0_26] : memref<2x10x256xf32, #tpu.memory_space<vmem>>, vector<1x10x256xf32>
    %31 = vector.shape_cast %30 : vector<1x10x256xf32> to vector<10x256xf32>
    %cst_27 = arith.constant dense<0.000000e+00> : vector<20x256xf32>
    %32 = tpu.matmul %0, %29, %cst_27 {dimension_numbers = #tpu.dot_dimension_numbers<[1], [0], [0], [1], [0, 0, 1, 1], [], []>} : vector<20x10xf32>, vector<10x256xf32>, vector<20x256xf32> -> vector<20x256xf32>
    %cst_28 = arith.constant dense<0.000000e+00> : vector<20x256xf32>
    %33 = tpu.matmul %1, %31, %cst_28 {dimension_numbers = #tpu.dot_dimension_numbers<[1], [0], [0], [1], [0, 0, 1, 1], [], []>} : vector<20x10xf32>, vector<10x256xf32>, vector<20x256xf32> -> vector<20x256xf32>
    %34 = arith.addf %32, %33 : vector<20x256xf32>
    %35 = vector.broadcast %2 : vector<20x1xf32> to vector<20x256xf32>
    %36 = arith.addf %34, %35 : vector<20x256xf32>
    %cst_29 = arith.constant 0.00999999977 : f32
    %37 = vector.broadcast %cst_29 : f32 to vector<20x256xf32>
    %38 = arith.mulf %37, %36 : vector<20x256xf32>
    %39 = arith.maximumf %36, %38 : vector<20x256xf32>
    %cst_30 = arith.constant dense<0.000000e+00> : vector<1x256xf32>
    %40 = tpu.matmul %3, %39, %cst_30 {dimension_numbers = #tpu.dot_dimension_numbers<[1], [0], [0], [1], [0, 0, 1, 1], [], []>} : vector<1x20xf32>, vector<20x256xf32>, vector<1x256xf32> -> vector<1x256xf32>
    %41 = vector.broadcast %4 : vector<1x1xf32> to vector<1x256xf32>
    %42 = arith.addf %40, %41 : vector<1x256xf32>
    %43 = arith.negf %42 : vector<1x256xf32>
    %44 = math.exp %43 : vector<1x256xf32>
    %cst_31 = arith.constant 1.000000e+00 : f32
    %45 = vector.broadcast %cst_31 : f32 to vector<1x256xf32>
    %46 = arith.addf %45, %44 : vector<1x256xf32>
    %47 = arith.divf %45, %46 : vector<1x256xf32>
    %c1_32 = arith.constant 1 : index
    %c0_33 = arith.constant 0 : index
    %c0_34 = arith.constant 0 : index
    %48 = vector.load %arg9[%c1_32, %c0_33, %c0_34] : memref<2x1x256xf32, #tpu.memory_space<vmem>>, vector<1x1x256xf32>
    %49 = vector.shape_cast %48 : vector<1x1x256xf32> to vector<1x256xf32>
    %50 = vector.shape_cast %47 : vector<1x256xf32> to vector<1x1x256xf32>
    tpu.vector_store %arg9[%c1_32, %c0_33, %c0_34], %50 {strides = array<i32>} : memref<2x1x256xf32, #tpu.memory_space<vmem>>, vector<1x1x256xf32>,
    return
  }
  func.func @transform_0(%arg0: i32, %arg1: i32) -> (i32, i32, i32) {
    %c0_i32 = arith.constant 0 : i32
    %c0_i32_0 = arith.constant 0 : i32
    return %arg0, %c0_i32, %arg1 : i32, i32, i32
  }
  func.func @transform_1(%arg0: i32, %arg1: i32) -> (i32, i32, i32) {
    %c0_i32 = arith.constant 0 : i32
    %c0_i32_0 = arith.constant 0 : i32
    return %arg0, %c0_i32, %arg1 : i32, i32, i32
  }
  func.func @transform_2(%arg0: i32, %arg1: i32) -> (i32, i32) {
    %c0_i32 = arith.constant 0 : i32
    %c0_i32_0 = arith.constant 0 : i32
    %c0_i32_1 = arith.constant 0 : i32
    return %c0_i32, %c0_i32_0 : i32, i32
  }
  func.func @transform_3(%arg0: i32, %arg1: i32) -> (i32, i32) {
    %c0_i32 = arith.constant 0 : i32
    %c0_i32_0 = arith.constant 0 : i32
    %c0_i32_1 = arith.constant 0 : i32
    return %c0_i32, %c0_i32_0 : i32, i32
  }
  func.func @transform_4(%arg0: i32, %arg1: i32) -> (i32, i32) {
    %c0_i32 = arith.constant 0 : i32
    %c0_i32_0 = arith.constant 0 : i32
    %c0_i32_1 = arith.constant 0 : i32
    return %c0_i32, %c0_i32_0 : i32, i32
  }
  func.func @transform_5(%arg0: i32, %arg1: i32) -> (i32, i32) {
    %c0_i32 = arith.constant 0 : i32
    %c0_i32_0 = arith.constant 0 : i32
    %c0_i32_1 = arith.constant 0 : i32
    return %c0_i32, %c0_i32_0 : i32, i32
  }
  func.func @transform_6(%arg0: i32, %arg1: i32) -> (i32, i32) {
    %c0_i32 = arith.constant 0 : i32
    %c0_i32_0 = arith.constant 0 : i32
    %c0_i32_1 = arith.constant 0 : i32
    return %c0_i32, %c0_i32_0 : i32, i32
  }
  func.func @transform_7(%arg0: i32, %arg1: i32) -> (i32, i32, i32) {
    %c0_i32 = arith.constant 0 : i32
    %c0_i32_0 = arith.constant 0 : i32
    return %arg0, %c0_i32, %arg1 : i32, i32, i32
  }
}

</mosaic_0001>

<bundles_post_ra>
// kernel: tpu_custom_call.1
= control target key start
LH: loop header
LB: loop body
LE: loop exit
PB: predicated region body
PF: predicated region fallthrough
CT: control target
= control target key end

     0   :  { %s919_s0 = inlined_call_operand.vmem [shape: f32[2,10,256], index: 0, kind: input, shape index: {}]   ;;  %s920_s1 = inlined_call_operand.vmem [shape: f32[2,10,256], index: 1, kind: input, shape index: {}]   ;;  %s921_s2 = inlined_call_operand.vmem [shape: f32[20,10], index: 2, kind: input, shape index: {}]   ;;  %s922_s3 = inlined_call_operand.vmem [shape: f32[20,10], index: 3, kind: input, shape index: {}]   ;;  %s923_s4 = inlined_call_operand.vmem [shape: f32[20,1], index: 4, kind: input, shape index: {}]   ;;  %s924_s5 = inlined_call_operand.vmem [shape: f32[1,20], index: 5, kind: input, shape index: {}]   ;;  %s925_s6 = inlined_call_operand.<no memory space> [shape: f32[1,1], index: 6, kind: input, shape index: {}]   ;;  %s926_s7 = inlined_call_operand.hbm [shape: f32[2,1,256], index: 7, kind: output, shape index: {}]  }
   0x1   :  { %v12_v0 = vstv %s925_s6 }
   0x2   :  { %13 = vst [vmem:[#allocation2] sm:$0x1] %v12_v0 }
   0x3   :  { %v42_v1 = vld [vmem:[%s919_s0 + $0x10] sm:$0x3]  ;;  %vm58_vm0 = vcmask 1041408   ;;  %v43_v2 = vld [vmem:[%s919_s0 + $0x18] sm:$0x3]  ;;  %v40_v3 = vld [vmem:[%s919_s0] sm:$0xff] }
   0x4   :  { %584 = vmatpush.msk.msra.mxu2 %vm58_vm0, %v42_v1  ;;  %588 = vmatpush.msk.msra.mxu3 %vm58_vm0, %v43_v2  ;;  %v41_v4 = vld [vmem:[%s919_s0 + $0x8] sm:$0xff]  ;;  %v740_v5 = vld [vmem:[%s921_s2] sm:$0xff]  ;;  %vm48_vm1 = vcmask 80896   ;;  %v46_v6 = vld [vmem:[%s920_s1 + $0x10] sm:$0x3]  ;;  %v676_v9 = vmov 0  }
   0x5   :  { %576 = vmatpush.msk.msra.mxu0 %vm58_vm0, %v46_v6  ;;  %v47_v7 = vld [vmem:[%s920_s1 + $0x18] sm:$0x3]  ;;  %v44_v8 = vld [vmem:[%s920_s1] sm:$0xff]  ;;  %633 = vset.pattern.permute.xlu1 %v676_v9  ;;  %v45_v11 = vld [vmem:[%s920_s1 + $0x8] sm:$0xff] }
   0x6   :  { %147 = vmatpush.msra.mxu2 %v40_v3  ;;  %173 = vmatpush.msra.mxu3 %v41_v4  ;;  %v32_v10 = vld [vmem:[%s922_s3] sm:$0xff]  ;;  %v37_v12 = vld [vmem:[%s923_s4 + $0x10] sm:$0xf] }
   0x7   :  { %585 = vmatmul.msk.f32.vlgmr.msra.gmra.mxu2 %vm48_vm1, %v740_v5  ;;  %589 = vmatmul.msk.f32.vlgmr.msra.gmra.mxu3 %vm48_vm1, %v740_v5  ;;  %v35_v13 = vld [vmem:[%s923_s4] sm:$0xff] }
   0x8   :  { %580 = vmatpush.msk.msra.mxu1 %vm58_vm0, %v47_v7  ;;  %80 = vmatpush.msra.mxu0 %v44_v8 }
   0x9   :  { %577 = vmatmul.msk.f32.vlgmr.msra.gmra.mxu0 %vm48_vm1, %v32_v10  ;;  %632 = vset.pattern.permute.xlu0 %v676_v9 }
   0xa   :  { %14 = vsyncpa [#allocation4], 0  ;;  %106 = vmatpush.msra.mxu1 %v45_v11  ;;  %196 = vperm.xlu0 %632, %v37_v12   ;;  %v774_v14 = vld [vmem:[%s921_s2 + $0x8] sm:$0xff]  ;;  %v39_v17 = vld [vmem:[#allocation2] sm:$0x1]  ;;  %vm227_vm2 = vcmask 1043456  }
   0xb   :  { %581 = vmatmul.msk.f32.vlgmr.msra.gmra.mxu1 %vm48_vm1, %v32_v10  ;;  %186 = vperm.xlu1 %633, %v35_v13   ;;  %v33_v15 = vld [vmem:[%s922_s3 + $0x8] sm:$0xff]  ;;  %v791_v18 = vld [vmem:[%s921_s2 + $0x10] sm:$0xf]  ;;  %v605_v20 = vld [vmem:[%s920_s1 + $0x38] sm:$0x3]  ;;  %vm223_vm3 = vcmask 162816  }
   0xc   :  { %v36_v16 = vld [vmem:[%s923_s4 + $0x8] sm:$0xff]  ;;  %v34_v19 = vld [vmem:[%s922_s3 + $0x10] sm:$0xf]  ;;  %610 = vmatpush.msk.msrb.mxu3 %vm58_vm0, %v605_v20  ;;  %v602_v24 = vld [vmem:[%s920_s1 + $0x20] sm:$0xff]  ;;  %vm315_vm5 = vcmask 1040384   ;;  %s564_s28 = sshll.u32 %s926_s7, 4  ;;  %s565_s28 = int_to_ptr.hbm [resolvable:$true] %s564_s28 }
   0xd   :  { %v604_v22 = vld [vmem:[%s920_s1 + $0x30] sm:$0x3]  ;;  %v603_v25 = vld [vmem:[%s920_s1 + $0x28] sm:$0xff]  ;;  %v839_v63 = vld [vmem:[%s924_s5] sm:$0x1]  ;;  %s678_s29 = smov 32  }
   0xe   :  { %606 = vmatpush.msk.msrb.mxu2 %vm58_vm0, %v604_v22  ;;  %380 = vmatpush.msrb.mxu3 %v603_v25  ;;  %v600_v0 = vld [vmem:[%s919_s0 + $0x30] sm:$0x3]  ;;  %v601_v1 = vld [vmem:[%s919_s0 + $0x38] sm:$0x3]  ;;  %v598_v2 = vld [vmem:[%s919_s0 + $0x20] sm:$0xff]  ;;  %s679_s30 = smov 2  }
   0xf   :  { %586 = vmatmul.msk.f32.gmra.mxu2 %vm48_vm1, %v774_v14  ;;  %590 = vmatmul.msk.f32.gmra.mxu3 %vm48_vm1, %v774_v14  ;;  %v599_v3 = vld [vmem:[%s919_s0 + $0x28] sm:$0xff]  ;;  %s677_s0 = smov [#allocation3]  }
  0x10   :  { %354 = vmatpush.msrb.mxu2 %v602_v24  ;;  %s562_s25 = sshll.u32 %s677_s0, 4  ;;  %s563_s25 = int_to_ptr.vmem [resolvable:$true] %s562_s25 }
  0x11   :  { %578 = vmatmul.msk.f32.gmra.mxu0 %vm48_vm1, %v33_v15 }
  0x12   :  { %191 = vperm.xlu0 %632, %v36_v16  }
  0x13   :  { %582 = vmatmul.msk.f32.gmra.mxu1 %vm48_vm1, %v33_v15  ;;  %219 = vperm.xlu1 %633, %v39_v17  }
  0x17   :  { %587 = vmatmul.msk.f32.gmra.mxu2 %vm48_vm1, %v791_v18  ;;  %591 = vmatmul.msk.f32.gmra.mxu3 %vm48_vm1, %v791_v18 }
  0x19   :  { %579 = vmatmul.msk.f32.gmra.mxu0 %vm48_vm1, %v34_v19 }
  0x1b   :  { %583 = vmatmul.msk.f32.gmra.mxu1 %vm48_vm1, %v34_v19 }
  0x1f   :  { %607 = vmatmul.msk.f32.vlgmr.msrb.gmra.mxu2 %vm48_vm1, %v32_v10  ;;  %611 = vmatmul.msk.f32.vlgmr.msrb.gmra.mxu3 %vm48_vm1, %v32_v10 }
  0x27   :  { %608 = vmatmul.msk.f32.gmra.mxu2 %vm48_vm1, %v33_v15  ;;  %612 = vmatmul.msk.f32.gmra.mxu3 %vm48_vm1, %v33_v15 }
  0x2f   :  { %609 = vmatmul.msk.f32.gmra.mxu2 %vm48_vm1, %v34_v19  ;;  %613 = vmatmul.msk.f32.gmra.mxu3 %vm48_vm1, %v34_v19 }
  0x7c   :  { %v818_v28 = vpop.permute.xlu0 %196 }
  0x7d   :  { %v824_v40 = vpop.permute.xlu1 %186 }
  0x84   :  { %v822_v35 = vpop.permute.xlu0 %191 }
  0x85   :  { %v220_v4 = vpop.permute.xlu1 %219 }
  0x86   :  { %v82_v21 = vpop.f32.mrf.mxu0  ;;  %v871_v6 = vperm.slane %v220_v4, 0 }
  0x88   :  { %v108_v23 = vpop.f32.mrf.mxu1 }
  0x8a   :  { %v149_v26 = vpop.f32.mrf.mxu2  ;;  %v175_v27 = vpop.f32.mrf.mxu3 }
  0x8b   :  { %v150_v38 = vadd.f32 %v149_v26, %v82_v21  ;;  %v176_v39 = vadd.f32 %v175_v27, %v108_v23 }
  0x8d   :  { %v199_v49 = vadd.f32 %v824_v40, %v150_v38  ;;  %v200_v50 = vadd.f32 %v824_v40, %v176_v39 }
  0x8e   :  { %v85_v29 = vpop.f32.mrf.mxu0 }
  0x8f   :  { %v205_v57 = vmul.f32 0.01, %v199_v49  ;;  %v206_v58 = vmul.f32 0.01, %v200_v50 }
  0x90   :  { %v111_v30 = vpop.f32.mrf.mxu1 }
  0x91   :  { %v211_v61 = vmax.f32 %v199_v49, %v205_v57  ;;  %v212_v62 = vmax.f32 %v200_v50, %v206_v58 }
  0x92   :  { %v152_v31 = vpop.f32.mrf.mxu2  ;;  %v178_v32 = vpop.f32.mrf.mxu3 }
  0x93   :  { %v153_v33 = vadd.f32 %v152_v31, %v85_v29  ;;  %v179_v34 = vadd.f32 %v178_v32, %v111_v30 }
  0x95   :  { %v201_v43 = vadd.f32 %v822_v35, %v153_v33  ;;  %v202_v46 = vadd.f32 %v822_v35, %v179_v34 }
  0x96   :  { %v88_v36 = vpop.f32.mrf.mxu0 }
  0x97   :  { %v207_v51 = vmul.f32 0.01, %v201_v43  ;;  %v208_v54 = vmul.f32 0.01, %v202_v46 }
  0x98   :  { %v114_v37 = vpop.f32.mrf.mxu1 }
  0x99   :  { %v213_v59 = vmax.f32 %v201_v43, %v207_v51  ;;  %v214_v60 = vmax.f32 %v202_v46, %v208_v54 }
  0x9a   :  { %v155_v41 = vpop.f32.mrf.mxu2  ;;  %v181_v42 = vpop.f32.mrf.mxu3 }
  0x9b   :  { %v156_v44 = vadd.f32 %v155_v41, %v88_v36  ;;  %v182_v45 = vadd.f32 %v181_v42, %v114_v37  ;;  %v318_v37 = vlaneseq }
  0x9d   :  { %v203_v47 = vadd.f32 %v818_v28, %v156_v44  ;;  %v204_v48 = vadd.f32 %v818_v28, %v182_v45  ;;  %vm891_vm13 = vcmp.lt.s32.totalorder %v318_v37, 256 }
  0x9f   :  { %v209_v52 = vmul.f32 0.01, %v203_v47  ;;  %v210_v53 = vmul.f32 0.01, %v204_v48 }
  0xa1   :  { %v215_v55 = vmax.f32 %v203_v47, %v209_v52  ;;  %v216_v56 = vmax.f32 %v204_v48, %v210_v53 }
  0xa2   :  { %v356_v10 = vpop.f32.mrf.mxu2  ;;  %v382_v11 = vpop.f32.mrf.mxu3 }
  0xa3   :  { %592 = vmatpush.msk.msrb.mxu0 %vm227_vm2, %v215_v55  ;;  %594 = vmatpush.msk.msrb.mxu1 %vm227_vm2, %v216_v56 }
  0xa5   :  { %248 = vmatpush.msrb.mxu0 %v213_v59  ;;  %268 = vmatpush.msrb.mxu1 %v214_v60 }
  0xa7   :  { %249 = vmatpush.msrb.mxu0 %v211_v61  ;;  %269 = vmatpush.msrb.mxu1 %v212_v62 }
  0xa8   :  { %593 = vmatmul.msk.f32.vlgmr.msrb.gmra.mxu0 %vm223_vm3, %v839_v63  ;;  %595 = vmatmul.msk.f32.vlgmr.msrb.gmra.mxu1 %vm223_vm3, %v839_v63 }
  0xa9   :  { %614 = vmatpush.msk.msra.mxu0 %vm58_vm0, %v600_v0  ;;  %618 = vmatpush.msk.msra.mxu1 %vm58_vm0, %v601_v1 }
  0xaa   :  { %v359_v19 = vpop.f32.mrf.mxu2  ;;  %v385_v20 = vpop.f32.mrf.mxu3 }
  0xab   :  { %412 = vmatpush.msra.mxu0 %v598_v2  ;;  %438 = vmatpush.msra.mxu1 %v599_v3 }
  0xb0   :  { %615 = vmatmul.msk.f32.vlgmr.msra.gmra.mxu0 %vm48_vm1, %v740_v5  ;;  %619 = vmatmul.msk.f32.vlgmr.msra.gmra.mxu1 %vm48_vm1, %v740_v5 }
  0xb2   :  { %v362_v34 = vpop.f32.mrf.mxu2  ;;  %v388_v36 = vpop.f32.mrf.mxu3 }
  0xb8   :  { %616 = vmatmul.msk.f32.gmra.mxu0 %vm48_vm1, %v774_v14  ;;  %620 = vmatmul.msk.f32.gmra.mxu1 %vm48_vm1, %v774_v14 }
  0xc0   :  { %617 = vmatmul.msk.f32.gmra.mxu0 %vm48_vm1, %v791_v18  ;;  %621 = vmatmul.msk.f32.gmra.mxu1 %vm48_vm1, %v791_v18 }
 0x125   :  { %v251_v7 = vpop.f32.mrf.mxu0  ;;  %v271_v8 = vpop.f32.mrf.mxu1 }
 0x126   :  { %v252_v9 = vadd.f32 %v251_v7, %v871_v6  ;;  %v272_v5 = vadd.f32 %v271_v8, %v871_v6 }
 0x128   :  { %v596_v12 = vmul.f32 -1.442695, %v252_v9  ;;  %v597_v13 = vmul.f32 -1.442695, %v272_v5 }
 0x12a   :  { %634 = vpow2.f32 %v596_v12 }
 0x12b   :  { %636 = vpow2.f32 %v597_v13 }
 0x12d   :  { %v414_v14 = vpop.f32.mrf.mxu0  ;;  %v440_v15 = vpop.f32.mrf.mxu1 }
 0x12e   :  { %v415_v22 = vadd.f32 %v414_v14, %v356_v10  ;;  %v441_v26 = vadd.f32 %v440_v15, %v382_v11 }
 0x130   :  { %v635_v16 = vpop.eup %634  ;;  %v876_v25 = vadd.f32 %v415_v22, %v824_v40  ;;  %v450_v41 = vadd.f32 %v441_v26, %v824_v40 }
 0x131   :  { %v637_v17 = vpop.eup %636  ;;  %v280_v18 = vadd.f32 1.0, %v635_v16 }
 0x132   :  { %v281_v21 = vadd.f32 1.0, %v637_v17  ;;  %v455_v39 = vmul.f32 0.01, %v876_v25  ;;  %v456_v1 = vmul.f32 0.01, %v450_v41 }
 0x133   :  { %638 = vrcp.f32 %v280_v18  ;;  %vm287_vm4 = vweird.f32 %v280_v18  ;;  %v291_v51 = vand.u32 2147483647, %v280_v18  ;;  %v293_v55 = vand.u32 2147483648, %v280_v18 }
 0x134   :  { %640 = vrcp.f32 %v281_v21  ;;  %v308_v43 = vand.u32 2147483648, %v281_v21  ;;  %v306_v53 = vand.u32 2147483647, %v281_v21  ;;  %vm302_vm9 = vweird.f32 %v281_v21 }
 0x135   :  { %v417_v23 = vpop.f32.mrf.mxu0  ;;  %v443_v24 = vpop.f32.mrf.mxu1  ;;  %vm292_vm12 = vcmp.eq.f32.partialorder %v291_v51, 8.507059e+37  ;;  %v461_v13 = vmax.f32 %v876_v25, %v455_v39  ;;  %v462_v14 = vmax.f32 %v450_v41, %v456_v1 }
 0x136   :  { %v418_v29 = vadd.f32 %v417_v23, %v359_v19  ;;  %v444_v30 = vadd.f32 %v443_v24, %v385_v20  ;;  %v309_v58 = vor.u32 1.1754944e-38, %v308_v43  ;;  %vm307_vm11 = vcmp.eq.f32.partialorder %v306_v53, 8.507059e+37 }
 0x138   :  { %v451_v44 = vadd.f32 %v418_v29, %v822_v35  ;;  %v452_v45 = vadd.f32 %v444_v30, %v822_v35 }
 0x139   :  { %v639_v27 = vpop.eup %638 }
 0x13a   :  { %v641_v31 = vpop.eup %640  ;;  %v283_v32 = vmul.f32 %v639_v27, %v280_v18  ;;  %vm288_vm6 = vweird.f32 %v639_v27  ;;  %v457_v59 = vmul.f32 0.01, %v451_v44  ;;  %v458_v60 = vmul.f32 0.01, %v452_v45 }
 0x13b   :  { %v298_v33 = vmul.f32 %v641_v31, %v281_v21  ;;  %vm303_vm7 = vweird.f32 %v641_v31  ;;  %vm885_vm8 = vmor %vm287_vm4, %vm288_vm6 }
 0x13c   :  { %v284_v38 = vsub.f32 1.0, %v283_v32  ;;  %vm304_vm10 = vmor %vm302_vm9, %vm303_vm7  ;;  %v463_v5 = vmax.f32 %v451_v44, %v457_v59  ;;  %v464_v10 = vmax.f32 %v452_v45, %v458_v60 }
 0x13d   :  { %v299_v42 = vsub.f32 1.0, %v298_v33  ;;  %v420_v46 = vpop.f32.mrf.mxu0  ;;  %v446_v47 = vpop.f32.mrf.mxu1 }
 0x13e   :  { %v285_v48 = vmul.f32 %v639_v27, %v284_v38  ;;  %v421_v49 = vadd.f32 %v420_v46, %v362_v34  ;;  %v447_v50 = vadd.f32 %v446_v47, %v388_v36 }
 0x13f   :  { %v300_v52 = vmul.f32 %v641_v31, %v299_v42 }
 0x140   :  { %v286_v54 = vadd.f32 %v639_v27, %v285_v48  ;;  %v453_v40 = vadd.f32 %v421_v49, %v818_v28  ;;  %v454_v56 = vadd.f32 %v447_v50, %v818_v28  ;;  %v294_v28 = vor.u32 1.1754944e-38, %v293_v55 }
 0x141   :  { %v301_v35 = vadd.f32 %v641_v31, %v300_v52 }
 0x142   :  { %v459_v61 = vmul.f32 0.01, %v453_v40  ;;  %v460_v62 = vmul.f32 0.01, %v454_v56  ;;  %v290_v2 = vsel %vm885_vm8, %v639_v27, %v286_v54 }
 0x143   :  { %v305_v0 = vsel %vm304_vm10, %v641_v31, %v301_v35  ;;  %v295_v11 = vsel %vm292_vm12, %v294_v28, %v290_v2 }
 0x144   :  { %v465_v3 = vmax.f32 %v453_v40, %v459_v61  ;;  %v466_v4 = vmax.f32 %v454_v56, %v460_v62  ;;  %v310_v7 = vsel %vm307_vm11, %v309_v58, %v305_v0 }
 0x145   :  { %v314_v8 = vrot.slane %v310_v7, 7 }
 0x146   :  { %622 = vmatpush.msk.msra.mxu2 %vm227_vm2, %v465_v3  ;;  %624 = vmatpush.msk.msra.mxu3 %vm227_vm2, %v466_v4 }
 0x147   :  { %v316_v12 = vsel %vm315_vm5, %v295_v11, %v314_v8 }
 0x148   :  { %487 = vmatpush.msra.mxu2 %v463_v5  ;;  %507 = vmatpush.msra.mxu3 %v464_v10  ;;  %322 = vst.msk [vmem:[#allocation3] sm:$0x3] %vm891_vm13, %v316_v12 }
 0x14a   :  { %488 = vmatpush.msra.mxu2 %v461_v13  ;;  %508 = vmatpush.msra.mxu3 %v462_v14 }
 0x14b   :  { %623 = vmatmul.msk.f32.vlgmr.msra.gmra.mxu2 %vm223_vm3, %v839_v63  ;;  %625 = vmatmul.msk.f32.vlgmr.msra.gmra.mxu3 %vm223_vm3, %v839_v63 }
 0x1ce   :  { %v490_v15 = vpop.f32.mrf.mxu2  ;;  %v510_v16 = vpop.f32.mrf.mxu3 }
 0x1cf   :  { %v491_v17 = vadd.f32 %v490_v15, %v871_v6  ;;  %v511_v18 = vadd.f32 %v510_v16, %v871_v6 }
 0x1d1   :  { %v626_v19 = vmul.f32 -1.442695, %v491_v17  ;;  %v627_v20 = vmul.f32 -1.442695, %v511_v18 }
 0x1d3   :  { %642 = vpow2.f32 %v626_v19 }
 0x1d4   :  { %644 = vpow2.f32 %v627_v20 }
 0x1d9   :  { %v643_v21 = vpop.eup %642 }
 0x1da   :  { %v645_v22 = vpop.eup %644  ;;  %v519_v23 = vadd.f32 1.0, %v643_v21 }
 0x1db   :  { %v520_v24 = vadd.f32 1.0, %v645_v22 }
 0x1dc   :  { %646 = vrcp.f32 %v519_v23  ;;  %vm526_vm0 = vweird.f32 %v519_v23  ;;  %v532_v36 = vand.u32 2147483648, %v519_v23  ;;  %v530_v38 = vand.u32 2147483647, %v519_v23 }
 0x1dd   :  { %648 = vrcp.f32 %v520_v24  ;;  %v547_v32 = vand.u32 2147483648, %v520_v24  ;;  %v545_v33 = vand.u32 2147483647, %v520_v24  ;;  %vm541_vm2 = vweird.f32 %v520_v24 }
 0x1de   :  { %v533_v44 = vor.u32 1.1754944e-38, %v532_v36  ;;  %vm531_vm6 = vcmp.eq.f32.partialorder %v530_v38, 8.507059e+37 }
 0x1df   :  { %v548_v41 = vor.u32 1.1754944e-38, %v547_v32  ;;  %vm546_vm4 = vcmp.eq.f32.partialorder %v545_v33, 8.507059e+37 }
 0x1e2   :  { %v647_v25 = vpop.eup %646 }
 0x1e3   :  { %v649_v26 = vpop.eup %648  ;;  %v522_v27 = vmul.f32 %v647_v25, %v519_v23  ;;  %vm527_vm14 = vweird.f32 %v647_v25 }
 0x1e4   :  { %v537_v63 = vmul.f32 %v649_v26, %v520_v24  ;;  %vm542_vm15 = vweird.f32 %v649_v26  ;;  %vm907_vm1 = vmor %vm526_vm0, %vm527_vm14 }
 0x1e5   :  { %v523_v29 = vsub.f32 1.0, %v522_v27  ;;  %vm543_vm3 = vmor %vm541_vm2, %vm542_vm15 }
 0x1e6   :  { %v538_v30 = vsub.f32 1.0, %v537_v63 }
 0x1e7   :  { %v524_v31 = vmul.f32 %v647_v25, %v523_v29 }
 0x1e8   :  { %v539_v6 = vmul.f32 %v649_v26, %v538_v30 }
 0x1e9   :  { %v525_v34 = vadd.f32 %v647_v25, %v524_v31 }
 0x1ea   :  { %v540_v39 = vadd.f32 %v649_v26, %v539_v6 }
 0x1eb   :  { %v529_v43 = vsel %vm907_vm1, %v647_v25, %v525_v34 }
 0x1ec   :  { %v544_v42 = vsel %vm543_vm3, %v649_v26, %v540_v39  ;;  %v534_v47 = vsel %vm531_vm6, %v533_v44, %v529_v43 }
 0x1ed   :  { %v549_v45 = vsel %vm546_vm4, %v548_v41, %v544_v42 }
 0x1ee   :  { %v553_v46 = vrot.slane %v549_v45, 7 }
 0x1f0   :  { %v554_v48 = vsel %vm315_vm5, %v534_v47, %v553_v46 }
 0x1f1   :  { %557 = vst.msk [vmem:[#allocation3 + $0x2] sm:$0x3] %vm891_vm13, %v554_v48 }
 0x1f2   :  { %570 = dma.vmem_to_hbm [thread:$0]  %s563_s25, 64, %s565_s28, [#allocation4], %s678_s29, %s678_s29, %s679_s30  }
 0x1f3   :  { %674 = dma.done.wait [#allocation4], 64  }
 0x1f4   :  { %675 = vsyncadd [#allocation4], 4294967232 }
 0x1f5   :  { %575 = vsyncpa [#allocation4], 1 }

</bundles_post_ra>
